<compile_context>
chip_gen: v5e
topology: v5e:2x2
jax: 0.10.0
libtpu: 0.0.40
codegen_flags: <defaults>
</compile_context>

<pallas_src>
import functools

import jax
import jax.numpy as jnp
import numpy as np
from jax.experimental import pallas as pl
from jax.experimental.pallas import tpu as pltpu

BN_EPS = 1e-5


def _round_up(x, m):
    return (x + m - 1) // m * m


# ----------------------------------------------------------------------------
# Pallas kernels: fused GEMM + folded-BN shift (+ residual) (+ ReLU)
# ----------------------------------------------------------------------------
def _make_gemm_kernel(nk, has_residual, relu):
    """Build a kernel:  out = act((A @ B) + shift [+ residual]).

    nk == 1  -> no accumulator scratch, direct epilogue write (fast path).
    nk  > 1  -> f32 accumulator scratch with init/finalize via pl.when.
    Returns (kernel_fn, needs_acc_scratch).
    """

    def _epilogue(acc, sh_ref, res_ref, o_ref):
        y = acc + sh_ref[...]
        if res_ref is not None:
            y = y + res_ref[...]
        if relu:
            y = jnp.maximum(y, 0.0)
        o_ref[...] = y.astype(o_ref.dtype)

    if nk == 1:
        if has_residual:
            def kernel(a_ref, b_ref, sh_ref, res_ref, o_ref):
                acc = jnp.dot(a_ref[...], b_ref[...],
                              preferred_element_type=jnp.float32)
                _epilogue(acc, sh_ref, res_ref, o_ref)
        else:
            def kernel(a_ref, b_ref, sh_ref, o_ref):
                acc = jnp.dot(a_ref[...], b_ref[...],
                              preferred_element_type=jnp.float32)
                _epilogue(acc, sh_ref, None, o_ref)
        return kernel, False

    def _accum(a_ref, b_ref, acc_ref):
        @pl.when(pl.program_id(2) == 0)
        def _():
            acc_ref[...] = jnp.zeros_like(acc_ref)

        acc_ref[...] += jnp.dot(a_ref[...], b_ref[...],
                                preferred_element_type=jnp.float32)

    if has_residual:
        def kernel(a_ref, b_ref, sh_ref, res_ref, o_ref, acc_ref):
            _accum(a_ref, b_ref, acc_ref)

            @pl.when(pl.program_id(2) == nk - 1)
            def _():
                _epilogue(acc_ref[...], sh_ref, res_ref, o_ref)
    else:
        def kernel(a_ref, b_ref, sh_ref, o_ref, acc_ref):
            _accum(a_ref, b_ref, acc_ref)

            @pl.when(pl.program_id(2) == nk - 1)
            def _():
                _epilogue(acc_ref[...], sh_ref, None, o_ref)
    return kernel, True


# ----------------------------------------------------------------------------
# GEMM wrapper
# ----------------------------------------------------------------------------
def gemm_fused(a, b_p, sh_p, n_out, residual=None, relu=True,
               out_dtype=jnp.float32):
    """out[:, :n_out] = act((A @ B) + shift [+ residual]).

    a      : (M, K)  activations (im2col patches); bf16 or f32 (cast here).
    b_p    : (Kp, Np) bf16 weight matrix with BN scale folded in, pre-padded.
    sh_p   : (1, Np)  f32 folded-BN shift (incl. conv bias), pre-padded.
    """
    M, K = a.shape
    Kp, Np = b_p.shape

    # ---- tile selection: few, fat tiles (these GEMMs are overhead-bound) ----
    Mp = _round_up(M, 8)
    if Mp <= 512:
        # Split into 2 parallel M tiles when possible so dual-TC chips (v7x)
        # can use both TensorCores; otherwise one full-M tile.
        tm = Mp // 2 if (Mp >= 128 and (Mp // 2) % 8 == 0) else Mp
    else:
        tm = 256
        Mp = _round_up(M, tm)

    if Kp <= 2048:            # single fat K tile (no K loop)
        tk = Kp
    else:
        tk = 512
        if Kp % tk:
            new_Kp = _round_up(Kp, tk)
            b_p = jnp.pad(b_p, ((0, new_Kp - Kp), (0, 0)))
            Kp = new_Kp

    if Np <= 512:             # full (padded) N in one lane-dense tile
        tn = Np
    else:
        tn = 512
        if Np % tn:
            new_Np = _round_up(Np, tn)
            b_p = jnp.pad(b_p, ((0, 0), (0, new_Np - Np)))
            sh_p = jnp.pad(sh_p, ((0, 0), (0, new_Np - Np)))
            Np = new_Np

    nk = Kp // tk

    # ---- operand prep: bf16 feeds the MXU, f32 accumulation in-kernel ----
    a_p = a if a.dtype == jnp.bfloat16 else a.astype(jnp.bfloat16)
    if (Mp != M) or (Kp != K):
        a_p = jnp.pad(a_p, ((0, Mp - M), (0, Kp - K)))

    in_specs = [
        pl.BlockSpec((tm, tk), lambda i, j, k: (i, k)),
        pl.BlockSpec((tk, tn), lambda i, j, k: (k, j)),
        pl.BlockSpec((1, tn), lambda i, j, k: (0, j)),
    ]
    args = [a_p, b_p, sh_p]

    has_residual = residual is not None
    if has_residual:
        res_p = residual.astype(jnp.float32)
        rM, rN = res_p.shape
        if (Mp != rM) or (Np != rN):
            res_p = jnp.pad(res_p, ((0, Mp - rM), (0, Np - rN)))
        in_specs.append(pl.BlockSpec((tm, tn), lambda i, j, k: (i, j)))
        args.append(res_p)

    kernel, needs_acc = _make_gemm_kernel(nk, has_residual, relu)
    scratch_shapes = [pltpu.VMEM((tm, tn), jnp.float32)] if needs_acc else []

    out = pl.pallas_call(
        kernel,
        out_shape=jax.ShapeDtypeStruct((Mp, Np), out_dtype),
        grid_spec=pltpu.PrefetchScalarGridSpec(
            num_scalar_prefetch=0,
            grid=(Mp // tm, Np // tn, nk),
            in_specs=in_specs,
            out_specs=pl.BlockSpec((tm, tn), lambda i, j, k: (i, j)),
            scratch_shapes=scratch_shapes,
        ),
        compiler_params=pltpu.CompilerParams(
            dimension_semantics=("parallel", "parallel", "arbitrary"),
            vmem_limit_bytes=32 * 1024 * 1024),
    )(*args)
    return out[:M, :n_out]


# ----------------------------------------------------------------------------
# Conv lowering (im2col with STATIC stride/pad/kernel sizes)
# ----------------------------------------------------------------------------
def _im2col(x, kh, kw, stride, pad):
    """x: (N,H,W,C) NHWC -> (N*Ho*Wo, kh*kw*C); tap order (kh, kw, C)."""
    N, H, W, C = x.shape
    Ho = (H + 2 * pad - kh) // stride + 1
    Wo = (W + 2 * pad - kw) // stride + 1
    xp = jnp.pad(x, ((0, 0), (pad, pad), (pad, pad), (0, 0))) if pad else x
    cols = [xp[:, i:i + stride * Ho:stride, j:j + stride * Wo:stride, :]
            for i in range(kh) for j in range(kw)]
    patches = cols[0] if len(cols) == 1 else jnp.concatenate(cols, axis=-1)
    return patches.reshape(N * Ho * Wo, kh * kw * C), Ho, Wo


def conv_bn(x, w_p, sh_p, cout, kh, kw, stride, pad, relu, residual=None,
            out_dtype=jnp.float32):
    """Conv2d + folded BN (+residual) (+ReLU) via im2col + fused Pallas GEMM."""
    N = x.shape[0]
    # Cast activations to bf16 before im2col: halves the patch-expansion traffic.
    patches, Ho, Wo = _im2col(x.astype(jnp.bfloat16), kh, kw, stride, pad)
    res = residual.reshape(N * Ho * Wo, -1) if residual is not None else None
    out = gemm_fused(patches, w_p, sh_p, cout, residual=res, relu=relu,
                     out_dtype=out_dtype)
    return out.reshape(N, Ho, Wo, cout)


# ----------------------------------------------------------------------------
# Parameters: deterministic init, BN folded + weights pre-packed (pad/bf16) once
# ----------------------------------------------------------------------------
def _fold_bn(gamma, beta, mean, var, conv_bias):
    scale = gamma / jnp.sqrt(var + BN_EPS)
    shift = beta - mean * scale + conv_bias * scale
    return scale, shift


def _pack_conv(w, scale, shift):
    """(kh,kw,cin,cout) f32 -> (Kp,Np) bf16 matrix (BN scale folded) + (1,Np) shift."""
    kh, kw, cin, cout = w.shape
    w = w * scale.reshape(1, 1, 1, -1)          # fold BN scale into the weight
    K = kh * kw * cin
    Kp = _round_up(K, 128)
    Np = _round_up(cout, 128)
    wm = jnp.pad(w.reshape(K, cout),
                 ((0, Kp - K), (0, Np - cout))).astype(jnp.bfloat16)
    sh = jnp.pad(shift.reshape(1, -1), ((0, 0), (0, Np - cout)))
    return wm, sh, w


def make_basic_block_params(key, cin, cout, stride):
    def conv_init(k, kh, kw, ci, co):
        k1, k2 = jax.random.split(k)
        bound = 1.0 / np.sqrt(kh * kw * ci)
        w = jax.random.uniform(k1, (kh, kw, ci, co), jnp.float32, -bound, bound)
        b = jax.random.uniform(k2, (co,), jnp.float32, -bound, bound)
        return w, b

    def bn_init(k, c):
        k1, k2, k3, k4 = jax.random.split(k, 4)
        gamma = 1.0 + 0.1 * jax.random.normal(k1, (c,), jnp.float32)
        beta = 0.1 * jax.random.normal(k2, (c,), jnp.float32)
        mean = 0.1 * jax.random.normal(k3, (c,), jnp.float32)
        var = jax.random.uniform(k4, (c,), jnp.float32, minval=0.5, maxval=1.5)
        return gamma, beta, mean, var

    keys = jax.random.split(key, 6)
    params, ref = {}, {}

    w1, b1 = conv_init(keys[0], 3, 3, cin, cout)
    sc1, sh1 = _fold_bn(*bn_init(keys[1], cout), b1)
    params["w1"], params["sh1"], wf1 = _pack_conv(w1, sc1, sh1)
    ref.update(w1=wf1, sh1=sh1)

    w2, b2 = conv_init(keys[2], 3, 3, cout, cout)
    sc2, sh2 = _fold_bn(*bn_init(keys[3], cout), b2)
    params["w2"], params["sh2"], wf2 = _pack_conv(w2, sc2, sh2)
    ref.update(w2=wf2, sh2=sh2)

    if stride != 1 or cin != cout:
        wd, bd = conv_init(keys[4], 1, 1, cin, cout)
        scd, shd = _fold_bn(*bn_init(keys[5], cout), bd)
        params["wd"], params["shd"], wfd = _pack_conv(wd, scd, shd)
        ref.update(wd=wfd, shd=shd)

    return params, ref


# ----------------------------------------------------------------------------
# Forward pass (stride / cout are STATIC python ints, baked via partial+jit)
# ----------------------------------------------------------------------------
def basic_block_forward(x_nchw, p, *, stride, cout):
    x = jnp.transpose(x_nchw, (0, 2, 3, 1))          # NCHW -> NHWC
    # conv1 output feeds only conv2's bf16 MXU operand -> emit it in bf16.
    out = conv_bn(x, p["w1"], p["sh1"], cout, 3, 3, stride, 1, relu=True,
                  out_dtype=jnp.bfloat16)
    if "wd" in p:
        identity = conv_bn(x, p["wd"], p["shd"], cout, 1, 1, stride, 0,
                           relu=False)                # f32, added in f32 epilogue
    else:
        identity = x
    # bn2(conv2(out)) + identity, then ReLU — fused in the GEMM epilogue.
    out = conv_bn(out, p["w2"], p["sh2"], cout, 3, 3, 1, 1, relu=True,
                  residual=identity)
    return jnp.transpose(out, (0, 3, 1, 2))          # NHWC -> NCHW


# ----------------------------------------------------------------------------
# Pure-JAX reference (same folded-weight bf16-operand / f32-accumulate numerics)
# ----------------------------------------------------------------------------
def reference_block(x_nhwc, r, stride):
    def conv(x, w, s, pad):
        return jax.lax.conv_general_dilated(
            x.astype(jnp.bfloat16), w.astype(jnp.bfloat16),
            window_strides=(s, s), padding=[(pad, pad), (pad, pad)],
            dimension_numbers=("NHWC", "HWIO", "NHWC"),
            preferred_element_type=jnp.float32)

    out = conv(x_nhwc, r["w1"], stride, 1) + r["sh1"]
    out = jnp.maximum(out, 0.0)
    out = conv(out, r["w2"], 1, 1) + r["sh2"]
    if "wd" in r:
        identity = conv(x_nhwc, r["wd"], stride, 0) + r["shd"]
    else:
        identity = x_nhwc
    return jnp.maximum(out + identity, 0.0)


# ----------------------------------------------------------------------------
if __name__ == "__main__":
    key = jax.random.PRNGKey(0)
    kx, kp = jax.random.split(key)

    N, CIN, H, W = 2, 32, 16, 16
    COUT, STRIDE = 64, 2          # exercises the conv1x1+BN shortcut path

    x = jax.random.normal(kx, (N, CIN, H, W), jnp.float32)   # NCHW like PyTorch
    params, ref_params = make_basic_block_params(kp, CIN, COUT, STRIDE)

    fwd = jax.jit(functools.partial(basic_block_forward, stride=STRIDE, cout=COUT))
    out = fwd(x, params)
    jax.block_until_ready(out)

    assert out.shape == (N, COUT, H // STRIDE, W // STRIDE)
    assert out.dtype == jnp.float32
    assert bool(jnp.all(jnp.isfinite(out)))

    # Correctness check against a plain-JAX reference with matching bf16 numerics.
    ref = reference_block(jnp.transpose(x, (0, 2, 3, 1)), ref_params, STRIDE)
    ref = jnp.transpose(ref, (0, 3, 1, 2))
    max_err = float(jnp.max(jnp.abs(out - ref)))
    assert max_err < 5e-2, f"max abs error {max_err}"

    print("KERNEL_OK")
</pallas_src>

<mosaic_0001>
module attributes {stable_mosaic.version = 11 : i64} {
  func.func @kernel(%arg0: i32, %arg1: i32, %arg2: i32, %arg3: memref<64x128xbf16, #tpu.memory_space<vmem>>, %arg4: memref<128x128xbf16, #tpu.memory_space<vmem>>, %arg5: memref<1x128xf32, #tpu.memory_space<vmem>>, %arg6: memref<64x128xf32, #tpu.memory_space<vmem>>) attributes {dimension_semantics = [#tpu.dimension_semantics<parallel>, #tpu.dimension_semantics<parallel>, #tpu.dimension_semantics<arbitrary>], iteration_bounds = array<i64: 2, 1, 1>, scalar_prefetch = 0 : i64, scratch_operands = 0 : i64, tpu.core_type = #tpu.core_type<tc>, window_params = [{transform_indices = @transform_0, window_bounds = array<i64: 64, 128>}, {transform_indices = @transform_1, window_bounds = array<i64: 128, 128>}, {transform_indices = @transform_2, window_bounds = array<i64: 1, 128>}, {transform_indices = @transform_3, window_bounds = array<i64: 64, 128>}]} {
    %c0 = arith.constant 0 : index
    %c0_0 = arith.constant 0 : index
    %0 = vector.load %arg3[%c0, %c0_0] : memref<64x128xbf16, #tpu.memory_space<vmem>>, vector<64x128xbf16>
    %c0_1 = arith.constant 0 : index
    %c0_2 = arith.constant 0 : index
    %1 = vector.load %arg4[%c0_1, %c0_2] : memref<128x128xbf16, #tpu.memory_space<vmem>>, vector<128x128xbf16>
    %cst = arith.constant dense<0.000000e+00> : vector<64x128xf32>
    %2 = tpu.matmul %0, %1, %cst {dimension_numbers = #tpu.dot_dimension_numbers<[1], [0], [0], [1], [0, 0, 1, 1], [], []>} : vector<64x128xbf16>, vector<128x128xbf16>, vector<64x128xf32> -> vector<64x128xf32>
    %c0_3 = arith.constant 0 : index
    %c0_4 = arith.constant 0 : index
    %3 = vector.load %arg5[%c0_3, %c0_4] : memref<1x128xf32, #tpu.memory_space<vmem>>, vector<1x128xf32>
    %4 = vector.broadcast %3 : vector<1x128xf32> to vector<64x128xf32>
    %5 = arith.addf %2, %4 : vector<64x128xf32>
    %c0_5 = arith.constant 0 : index
    %c0_6 = arith.constant 0 : index
    %6 = vector.load %arg6[%c0_5, %c0_6] : memref<64x128xf32, #tpu.memory_space<vmem>>, vector<64x128xf32>
    tpu.vector_store %arg6[%c0_5, %c0_6], %5 {strides = array<i32>} : memref<64x128xf32, #tpu.memory_space<vmem>>, vector<64x128xf32>,
    return
  }
  func.func @transform_0(%arg0: i32, %arg1: i32, %arg2: i32) -> (i32, i32) {
    %c0_i32 = arith.constant 0 : i32
    return %arg0, %arg2 : i32, i32
  }
  func.func @transform_1(%arg0: i32, %arg1: i32, %arg2: i32) -> (i32, i32) {
    %c0_i32 = arith.constant 0 : i32
    return %arg2, %arg1 : i32, i32
  }
  func.func @transform_2(%arg0: i32, %arg1: i32, %arg2: i32) -> (i32, i32) {
    %c0_i32 = arith.constant 0 : i32
    %c0_i32_0 = arith.constant 0 : i32
    return %c0_i32, %arg1 : i32, i32
  }
  func.func @transform_3(%arg0: i32, %arg1: i32, %arg2: i32) -> (i32, i32) {
    %c0_i32 = arith.constant 0 : i32
    return %arg0, %arg1 : i32, i32
  }
}

module attributes {stable_mosaic.version = 11 : i64} {
  func.func @kernel(%arg0: i32, %arg1: i32, %arg2: i32, %arg3: memref<64x384xbf16, #tpu.memory_space<vmem>>, %arg4: memref<384x128xbf16, #tpu.memory_space<vmem>>, %arg5: memref<1x128xf32, #tpu.memory_space<vmem>>, %arg6: memref<64x128xbf16, #tpu.memory_space<vmem>>) attributes {dimension_semantics = [#tpu.dimension_semantics<parallel>, #tpu.dimension_semantics<parallel>, #tpu.dimension_semantics<arbitrary>], iteration_bounds = array<i64: 2, 1, 1>, scalar_prefetch = 0 : i64, scratch_operands = 0 : i64, tpu.core_type = #tpu.core_type<tc>, window_params = [{transform_indices = @transform_0, window_bounds = array<i64: 64, 384>}, {transform_indices = @transform_1, window_bounds = array<i64: 384, 128>}, {transform_indices = @transform_2, window_bounds = array<i64: 1, 128>}, {transform_indices = @transform_3, window_bounds = array<i64: 64, 128>}]} {
    %c0 = arith.constant 0 : index
    %c0_0 = arith.constant 0 : index
    %0 = vector.load %arg3[%c0, %c0_0] : memref<64x384xbf16, #tpu.memory_space<vmem>>, vector<64x384xbf16>
    %c0_1 = arith.constant 0 : index
    %c0_2 = arith.constant 0 : index
    %1 = vector.load %arg4[%c0_1, %c0_2] : memref<384x128xbf16, #tpu.memory_space<vmem>>, vector<384x128xbf16>
    %cst = arith.constant dense<0.000000e+00> : vector<64x128xf32>
    %2 = tpu.matmul %0, %1, %cst {dimension_numbers = #tpu.dot_dimension_numbers<[1], [0], [0], [1], [0, 0, 1, 1], [], []>} : vector<64x384xbf16>, vector<384x128xbf16>, vector<64x128xf32> -> vector<64x128xf32>
    %c0_3 = arith.constant 0 : index
    %c0_4 = arith.constant 0 : index
    %3 = vector.load %arg5[%c0_3, %c0_4] : memref<1x128xf32, #tpu.memory_space<vmem>>, vector<1x128xf32>
    %4 = vector.broadcast %3 : vector<1x128xf32> to vector<64x128xf32>
    %5 = arith.addf %2, %4 : vector<64x128xf32>
    %cst_5 = arith.constant 0.000000e+00 : f32
    %6 = vector.broadcast %cst_5 : f32 to vector<64x128xf32>
    %7 = arith.maximumf %5, %6 : vector<64x128xf32>
    %8 = arith.truncf %7 : vector<64x128xf32> to vector<64x128xbf16>
    %c0_6 = arith.constant 0 : index
    %c0_7 = arith.constant 0 : index
    %9 = vector.load %arg6[%c0_6, %c0_7] : memref<64x128xbf16, #tpu.memory_space<vmem>>, vector<64x128xbf16>
    tpu.vector_store %arg6[%c0_6, %c0_7], %8 {strides = array<i32>} : memref<64x128xbf16, #tpu.memory_space<vmem>>, vector<64x128xbf16>,
    return
  }
  func.func @transform_0(%arg0: i32, %arg1: i32, %arg2: i32) -> (i32, i32) {
    %c0_i32 = arith.constant 0 : i32
    return %arg0, %arg2 : i32, i32
  }
  func.func @transform_1(%arg0: i32, %arg1: i32, %arg2: i32) -> (i32, i32) {
    %c0_i32 = arith.constant 0 : i32
    return %arg2, %arg1 : i32, i32
  }
  func.func @transform_2(%arg0: i32, %arg1: i32, %arg2: i32) -> (i32, i32) {
    %c0_i32 = arith.constant 0 : i32
    %c0_i32_0 = arith.constant 0 : i32
    return %c0_i32, %arg1 : i32, i32
  }
  func.func @transform_3(%arg0: i32, %arg1: i32, %arg2: i32) -> (i32, i32) {
    %c0_i32 = arith.constant 0 : i32
    return %arg0, %arg1 : i32, i32
  }
}

module attributes {stable_mosaic.version = 11 : i64} {
  func.func @kernel(%arg0: i32, %arg1: i32, %arg2: i32, %arg3: memref<64x640xbf16, #tpu.memory_space<vmem>>, %arg4: memref<640x128xbf16, #tpu.memory_space<vmem>>, %arg5: memref<1x128xf32, #tpu.memory_space<vmem>>, %arg6: memref<64x128xf32, #tpu.memory_space<vmem>>, %arg7: memref<64x128xf32, #tpu.memory_space<vmem>>) attributes {dimension_semantics = [#tpu.dimension_semantics<parallel>, #tpu.dimension_semantics<parallel>, #tpu.dimension_semantics<arbitrary>], iteration_bounds = array<i64: 2, 1, 1>, scalar_prefetch = 0 : i64, scratch_operands = 0 : i64, tpu.core_type = #tpu.core_type<tc>, window_params = [{transform_indices = @transform_0, window_bounds = array<i64: 64, 640>}, {transform_indices = @transform_1, window_bounds = array<i64: 640, 128>}, {transform_indices = @transform_2, window_bounds = array<i64: 1, 128>}, {transform_indices = @transform_3, window_bounds = array<i64: 64, 128>}, {transform_indices = @transform_4, window_bounds = array<i64: 64, 128>}]} {
    %c0 = arith.constant 0 : index
    %c0_0 = arith.constant 0 : index
    %0 = vector.load %arg3[%c0, %c0_0] : memref<64x640xbf16, #tpu.memory_space<vmem>>, vector<64x640xbf16>
    %c0_1 = arith.constant 0 : index
    %c0_2 = arith.constant 0 : index
    %1 = vector.load %arg4[%c0_1, %c0_2] : memref<640x128xbf16, #tpu.memory_space<vmem>>, vector<640x128xbf16>
    %cst = arith.constant dense<0.000000e+00> : vector<64x128xf32>
    %2 = tpu.matmul %0, %1, %cst {dimension_numbers = #tpu.dot_dimension_numbers<[1], [0], [0], [1], [0, 0, 1, 1], [], []>} : vector<64x640xbf16>, vector<640x128xbf16>, vector<64x128xf32> -> vector<64x128xf32>
    %c0_3 = arith.constant 0 : index
    %c0_4 = arith.constant 0 : index
    %3 = vector.load %arg5[%c0_3, %c0_4] : memref<1x128xf32, #tpu.memory_space<vmem>>, vector<1x128xf32>
    %4 = vector.broadcast %3 : vector<1x128xf32> to vector<64x128xf32>
    %5 = arith.addf %2, %4 : vector<64x128xf32>
    %c0_5 = arith.constant 0 : index
    %c0_6 = arith.constant 0 : index
    %6 = vector.load %arg6[%c0_5, %c0_6] : memref<64x128xf32, #tpu.memory_space<vmem>>, vector<64x128xf32>
    %7 = arith.addf %5, %6 : vector<64x128xf32>
    %cst_7 = arith.constant 0.000000e+00 : f32
    %8 = vector.broadcast %cst_7 : f32 to vector<64x128xf32>
    %9 = arith.maximumf %7, %8 : vector<64x128xf32>
    %c0_8 = arith.constant 0 : index
    %c0_9 = arith.constant 0 : index
    %10 = vector.load %arg7[%c0_8, %c0_9] : memref<64x128xf32, #tpu.memory_space<vmem>>, vector<64x128xf32>
    tpu.vector_store %arg7[%c0_8, %c0_9], %9 {strides = array<i32>} : memref<64x128xf32, #tpu.memory_space<vmem>>, vector<64x128xf32>,
    return
  }
  func.func @transform_0(%arg0: i32, %arg1: i32, %arg2: i32) -> (i32, i32) {
    %c0_i32 = arith.constant 0 : i32
    return %arg0, %arg2 : i32, i32
  }
  func.func @transform_1(%arg0: i32, %arg1: i32, %arg2: i32) -> (i32, i32) {
    %c0_i32 = arith.constant 0 : i32
    return %arg2, %arg1 : i32, i32
  }
  func.func @transform_2(%arg0: i32, %arg1: i32, %arg2: i32) -> (i32, i32) {
    %c0_i32 = arith.constant 0 : i32
    %c0_i32_0 = arith.constant 0 : i32
    return %c0_i32, %arg1 : i32, i32
  }
  func.func @transform_3(%arg0: i32, %arg1: i32, %arg2: i32) -> (i32, i32) {
    %c0_i32 = arith.constant 0 : i32
    return %arg0, %arg1 : i32, i32
  }
  func.func @transform_4(%arg0: i32, %arg1: i32, %arg2: i32) -> (i32, i32) {
    %c0_i32 = arith.constant 0 : i32
    return %arg0, %arg1 : i32, i32
  }
}

</mosaic_0001>

<bundles_post_ra>
// kernel: basic_block_forward.4
= control target key start
LH: loop header
LB: loop body
LE: loop exit
PB: predicated region body
PF: predicated region fallthrough
CT: control target
= control target key end

     0   :  { %s673_s12 = smov 0   ;;  %s675_s13 = smov 0   ;;  %s736_s0 = inlined_call_operand.vmem [shape: bf16[128,128], index: 0, kind: input, shape index: {}]   ;;  %s737_s1 = inlined_call_operand.vmem [shape: bf16[128,128], index: 1, kind: input, shape index: {}]   ;;  %s738_s2 = inlined_call_operand.vmem [shape: f32[1,128], index: 2, kind: input, shape index: {}]   ;;  %s739_s3 = inlined_call_operand.vmem [shape: f32[128,128], index: 3, kind: output, shape index: {}]  }
   0x1   :  { %s677_s14 = smov 0  }
   0x2 LB: > { %s32_s15 = sadd.s32 1, %s647_s13  ;;  %p513_p0 = scmp.ge.s32.totalorder %s651_s14, 1  ;;  %s651_s14 = sphi %s677_s14, %s13_s14   ;;  %s647_s13 = sphi %s675_s13, %s741_s13   ;;  %s643_s12 = sphi %s673_s12, %s740_s12  }
   0x3   : > { %p34_p1 = scmp.ge.s32.totalorder %s32_s15, 2  ;;  %p188_p2 = scmp.lt.s32.totalorder %s651_s14, 3 }
   0x5   : > { %s743_s15 = smov (%p34_p1, %s32_s15), 0  ;;  %p189_p3 = pnand %p513_p0, %p188_p2 }
   0x6   : > { %s514_s24 = sshll.u32 (!%p189_p3), %s643_s12, 3 }
   0x7   : > { %192 = sbr.rel (%p189_p3) target bundleno = 189 (0xbd), region = 32  ;;  %p230_p4 = scmp.lt.s32.totalorder (!%p189_p3), %s514_s24, 15 }
   0xc   : > { %v579_v0 = vld [vmem:[%s737_s1 + $0x38] sm:$0xff]  ;;  %v578_v1 = vld [vmem:[%s737_s1 + $0x30] sm:$0xff]  ;;  %v577_v2 = vld [vmem:[%s737_s1 + $0x28] sm:$0xff]  ;;  %s745_s24 = smov (!%p230_p4, %s514_s24), 15 }
   0xd   : > { %359 = vmatpush.bf16.msra.mxu0 %v579_v0  ;;  %580 = vmatpush.bf16.msra.mxu1 %v579_v0  ;;  %v576_v3 = vld [vmem:[%s737_s1 + $0x20] sm:$0xff]  ;;  %v575_v4 = vld [vmem:[%s737_s1 + $0x18] sm:$0xff]  ;;  %v574_v5 = vld [vmem:[%s737_s1 + $0x10] sm:$0xff]  ;;  %s515_s4 = sshll.u32 %s745_s24, 2  ;;  %s517_s10 = sshll.u32 %s745_s24, 3 }
   0xe   : > { %581 = vmatpush.bf16.msra.mxu2 %v579_v0  ;;  %582 = vmatpush.bf16.msra.mxu3 %v579_v0  ;;  %v573_v6 = vld [vmem:[%s737_s1 + $0x8] sm:$0xff]  ;;  %v572_v7 = vld [vmem:[%s737_s1] sm:$0xff]  ;;  %s236_s9 = scalar_lea.vmem %s736_s0, %s515_s4  ;;  %s257_s18 = scalar_lea.vmem %s739_s3, %s517_s10 }
   0xf   : > { %v568_v8 = vld [vmem:[%s236_s9] sm:$0xff]  ;;  %v569_v9 = vld [vmem:[%s236_s9 + $0x8] sm:$0xff]  ;;  %v570_v10 = vld [vmem:[%s236_s9 + $0x10] sm:$0xff] }
  0x10   : > { %v571_v11 = vld [vmem:[%s236_s9 + $0x18] sm:$0xff]  ;;  %v628_v12 = vld [vmem:[%s738_s2] ss:$0 sm:$0xff] }
  0x11   : > { %360 = vmatpush.bf16.msra.mxu0 %v578_v1  ;;  %583 = vmatpush.bf16.msra.mxu1 %v578_v1 }
  0x12   : > { %584 = vmatpush.bf16.msra.mxu2 %v578_v1  ;;  %585 = vmatpush.bf16.msra.mxu3 %v578_v1 }
  0x15   : > { %361 = vmatpush.bf16.msra.mxu0 %v577_v2  ;;  %586 = vmatpush.bf16.msra.mxu1 %v577_v2 }
  0x16   : > { %587 = vmatpush.bf16.msra.mxu2 %v577_v2  ;;  %588 = vmatpush.bf16.msra.mxu3 %v577_v2 }
  0x19   : > { %362 = vmatpush.bf16.msra.mxu0 %v576_v3  ;;  %589 = vmatpush.bf16.msra.mxu1 %v576_v3 }
  0x1a   : > { %590 = vmatpush.bf16.msra.mxu2 %v576_v3  ;;  %591 = vmatpush.bf16.msra.mxu3 %v576_v3 }
  0x1d   : > { %363 = vmatpush.bf16.msra.mxu0 %v575_v4  ;;  %592 = vmatpush.bf16.msra.mxu1 %v575_v4 }
  0x1e   : > { %593 = vmatpush.bf16.msra.mxu2 %v575_v4  ;;  %594 = vmatpush.bf16.msra.mxu3 %v575_v4 }
  0x21   : > { %364 = vmatpush.bf16.msra.mxu0 %v574_v5  ;;  %595 = vmatpush.bf16.msra.mxu1 %v574_v5 }
  0x22   : > { %596 = vmatpush.bf16.msra.mxu2 %v574_v5  ;;  %597 = vmatpush.bf16.msra.mxu3 %v574_v5 }
  0x25   : > { %365 = vmatpush.bf16.msra.mxu0 %v573_v6  ;;  %598 = vmatpush.bf16.msra.mxu1 %v573_v6 }
  0x26   : > { %599 = vmatpush.bf16.msra.mxu2 %v573_v6  ;;  %600 = vmatpush.bf16.msra.mxu3 %v573_v6 }
  0x29   : > { %366 = vmatpush.bf16.msra.mxu0 %v572_v7  ;;  %601 = vmatpush.bf16.msra.mxu1 %v572_v7 }
  0x2a   : > { %602 = vmatpush.bf16.msra.mxu2 %v572_v7  ;;  %603 = vmatpush.bf16.msra.mxu3 %v572_v7 }
  0x2c   : > { %367 = vmatmul.bf16.vlgmr.msra.gmra.mxu0 %v568_v8  ;;  %372 = vmatmul.bf16.vlgmr.msra.gmra.mxu1 %v569_v9 }
  0x2d   : > { %377 = vmatmul.bf16.vlgmr.msra.gmra.mxu2 %v570_v10  ;;  %382 = vmatmul.bf16.vlgmr.msra.gmra.mxu3 %v571_v11 }
  0xa9   : > { %v368_v13 = vpop.f32.mrf.mxu0  ;;  %v373_v14 = vpop.f32.mrf.mxu1 }
  0xaa   : > { %v369_v15 = vadd.f32 %v628_v12, %v368_v13  ;;  %v374_v16 = vadd.f32 %v628_v12, %v373_v14 }
  0xac   : > { %388 = vst [vmem:[%s257_s18] sm:$0xff] %v369_v15 }
  0xad   : > { %390 = vst [vmem:[%s257_s18 + $0x10] sm:$0xff] %v374_v16 }
  0xb0   : > { %v378_v17 = vpop.f32.mrf.mxu2  ;;  %v383_v18 = vpop.f32.mrf.mxu3 }
  0xb1   : > { %v379_v19 = vadd.f32 %v628_v12, %v378_v17  ;;  %v384_v20 = vadd.f32 %v628_v12, %v383_v18  ;;  %v370_v21 = vpop.f32.mrf.mxu0  ;;  %v375_v22 = vpop.f32.mrf.mxu1 }
  0xb2   : > { %v371_v23 = vadd.f32 %v628_v12, %v370_v21  ;;  %v376_v24 = vadd.f32 %v628_v12, %v375_v22 }
  0xb3   : > { %392 = vst [vmem:[%s257_s18 + $0x20] sm:$0xff] %v379_v19 }
  0xb4   : > { %394 = vst [vmem:[%s257_s18 + $0x30] sm:$0xff] %v384_v20 }
  0xb5   : > { %389 = vst [vmem:[%s257_s18 + $0x8] sm:$0xff] %v371_v23 }
  0xb6   : > { %391 = vst [vmem:[%s257_s18 + $0x18] sm:$0xff] %v376_v24 }
  0xb8   : > { %v380_v25 = vpop.f32.mrf.mxu2  ;;  %v385_v26 = vpop.f32.mrf.mxu3 }
  0xb9   : > { %v381_v27 = vadd.f32 %v628_v12, %v380_v25  ;;  %v386_v28 = vadd.f32 %v628_v12, %v385_v26 }
  0xbb   : > { %393 = vst [vmem:[%s257_s18 + $0x28] sm:$0xff] %v381_v27 }
  0xbc   : > { %395 = vst [vmem:[%s257_s18 + $0x38] sm:$0xff] %v386_v28 }
  0xbd PF: > { %s13_s14 = sadd.s32 1, %s651_s14   ;;  %s740_s12 = smov %s647_s13 }
  0xbe   : > { %p10_p5 = scmp.ge.s32.totalorder %s13_s14, 4   ;;  %s741_s13 = smov %s743_s15 }
  0xc0   :  { %12 = sbr.rel (!%p10_p5) target bundleno = 2 (0x2), region = 68 }

// kernel: basic_block_forward.3
= control target key start
LH: loop header
LB: loop body
LE: loop exit
PB: predicated region body
PF: predicated region fallthrough
CT: control target
= control target key end

     0   :  { %s1062_s12 = smov 0   ;;  %s1064_s13 = smov 0   ;;  %s1209_s0 = inlined_call_operand.vmem [shape: bf16[128,384], index: 0, kind: input, shape index: {}]   ;;  %s1210_s1 = inlined_call_operand.vmem [shape: bf16[384,128], index: 1, kind: input, shape index: {}]   ;;  %s1211_s2 = inlined_call_operand.vmem [shape: f32[1,128], index: 2, kind: input, shape index: {}]   ;;  %s1212_s3 = inlined_call_operand.vmem [shape: bf16[128,128], index: 3, kind: output, shape index: {}]  }
   0x1   :  { %s1066_s14 = smov 0  }
   0x2 LB: > { %s32_s15 = sadd.s32 1, %s1036_s13  ;;  %p774_p0 = scmp.ge.s32.totalorder %s1040_s14, 1  ;;  %s1040_s14 = sphi %s1066_s14, %s13_s14   ;;  %s1036_s13 = sphi %s1064_s13, %s1214_s13   ;;  %s1032_s12 = sphi %s1062_s12, %s1213_s12  }
   0x3   : > { %p34_p1 = scmp.ge.s32.totalorder %s32_s15, 2  ;;  %p191_p2 = scmp.lt.s32.totalorder %s1040_s14, 3 }
   0x5   : > { %s1216_s15 = smov (%p34_p1, %s32_s15), 0  ;;  %p192_p3 = pnand %p774_p0, %p191_p2 }
   0x6   : > { %s775_s7 = sshll.u32 (!%p192_p3), %s1032_s12, 3 }
   0x7   : > { %195 = sbr.rel (%p192_p3) target bundleno = 241 (0xf1), region = 32  ;;  %p236_p4 = scmp.lt.s32.totalorder (!%p192_p3), %s775_s7, 15 }
   0xc   : > { %v944_v0 = vld [vmem:[%s1210_s1 + $0x38] sm:$0xff]  ;;  %v943_v3 = vld [vmem:[%s1210_s1 + $0x30] sm:$0xff]  ;;  %v942_v6 = vld [vmem:[%s1210_s1 + $0x28] sm:$0xff]  ;;  %s1218_s7 = smov (!%p236_p4, %s775_s7), 15 }
   0xd   : > { %v952_v1 = vld [vmem:[%s1210_s1 + $0x78] sm:$0xff]  ;;  %543 = vmatpush.bf16.msra.mxu0 %v944_v0  ;;  %v951_v4 = vld [vmem:[%s1210_s1 + $0x70] sm:$0xff]  ;;  %984 = vmatpush.bf16.msra.mxu3 %v944_v0  ;;  %v950_v7 = vld [vmem:[%s1210_s1 + $0x68] sm:$0xff]  ;;  %s992_s27 = smul.u32 12, %s1218_s7  ;;  %s778_s24 = sshll.u32 %s1218_s7, 2 }
   0xe   : > { %v960_v2 = vld [vmem:[%s1210_s1 + $0xb8] sm:$0xff]  ;;  %572 = vmatpush.bf16.msra.mxu1 %v952_v1  ;;  %v959_v5 = vld [vmem:[%s1210_s1 + $0xb0] sm:$0xff]  ;;  %v958_v8 = vld [vmem:[%s1210_s1 + $0xa8] sm:$0xff] }
   0xf   : > { %601 = vmatpush.bf16.msra.mxu2 %v960_v2  ;;  %v941_v9 = vld [vmem:[%s1210_s1 + $0x20] sm:$0xff]  ;;  %v940_v12 = vld [vmem:[%s1210_s1 + $0x18] sm:$0xff]  ;;  %v939_v15 = vld [vmem:[%s1210_s1 + $0x10] sm:$0xff]  ;;  %s1149_s10 = scalar_lea.vmem %s1209_s0, %s992_s27  ;;  %s1194_s27 = scalar_lea.vmem %s1212_s3, %s778_s24 }
  0x10   : > { %v949_v10 = vld [vmem:[%s1210_s1 + $0x60] sm:$0xff]  ;;  %v948_v13 = vld [vmem:[%s1210_s1 + $0x58] sm:$0xff]  ;;  %v947_v16 = vld [vmem:[%s1210_s1 + $0x50] sm:$0xff] }
  0x11   : > { %544 = vmatpush.bf16.msra.mxu0 %v943_v3  ;;  %985 = vmatpush.bf16.msra.mxu3 %v943_v3  ;;  %v957_v11 = vld [vmem:[%s1210_s1 + $0xa0] sm:$0xff]  ;;  %v956_v14 = vld [vmem:[%s1210_s1 + $0x98] sm:$0xff]  ;;  %v955_v17 = vld [vmem:[%s1210_s1 + $0x90] sm:$0xff] }
  0x12   : > { %573 = vmatpush.bf16.msra.mxu1 %v951_v4  ;;  %v938_v18 = vld [vmem:[%s1210_s1 + $0x8] sm:$0xff]  ;;  %v937_v21 = vld [vmem:[%s1210_s1] sm:$0xff]  ;;  %v783_v27 = vld [vmem:[%s1149_s10 + $0xc] sm:$0xf0] }
  0x13   : > { %602 = vmatpush.bf16.msra.mxu2 %v959_v5  ;;  %v946_v19 = vld [vmem:[%s1210_s1 + $0x48] sm:$0xff]  ;;  %v945_v22 = vld [vmem:[%s1210_s1 + $0x40] sm:$0xff]  ;;  %v927_v29 = vld [vmem:[%s1149_s10 + $0x10] sm:$0xf0] }
  0x14   : > { %v954_v20 = vld [vmem:[%s1210_s1 + $0x88] sm:$0xff]  ;;  %v953_v23 = vld [vmem:[%s1210_s1 + $0x80] sm:$0xff]  ;;  %v793_v30 = vld [vmem:[%s1149_s10 + $0x18] sm:$0xf] }
  0x15   : > { %545 = vmatpush.bf16.msra.mxu0 %v942_v6  ;;  %986 = vmatpush.bf16.msra.mxu3 %v942_v6  ;;  %v781_v24 = vld [vmem:[%s1149_s10] sm:$0xf]  ;;  %v926_v25 = vld [vmem:[%s1149_s10 + $0x8] sm:$0xf0]  ;;  %v925_v26 = vld [vmem:[%s1149_s10 + $0x4] sm:$0xf] }
  0x16   : > { %574 = vmatpush.bf16.msra.mxu1 %v950_v7  ;;  %v789_v28 = vld [vmem:[%s1149_s10 + $0x8] sm:$0xf]  ;;  %v929_v31 = vld [vmem:[%s1149_s10 + $0x20] sm:$0xf0]  ;;  %v782_v32 = vor.u32 %v926_v25, %v781_v24  ;;  %v786_v33 = vor.u32 %v925_v26, %v783_v27  ;;  %v928_v36 = vld [vmem:[%s1149_s10 + $0x1c] sm:$0xf] }
  0x17   : > { %603 = vmatpush.bf16.msra.mxu2 %v958_v8  ;;  %v790_v34 = vor.u32 %v927_v29, %v789_v28  ;;  %v794_v35 = vor.u32 %v929_v31, %v793_v30  ;;  %v795_v37 = vld [vmem:[%s1149_s10 + $0x24] sm:$0xf0]  ;;  %v801_v38 = vld [vmem:[%s1149_s10 + $0x20] sm:$0xf]  ;;  %v930_v39 = vld [vmem:[%s1149_s10 + $0x28] sm:$0xf0] }
  0x18   : > { %v805_v40 = vld [vmem:[%s1149_s10 + $0x30] sm:$0xf]  ;;  %v932_v41 = vld [vmem:[%s1149_s10 + $0x38] sm:$0xf0]  ;;  %v798_v42 = vor.u32 %v928_v36, %v795_v37  ;;  %v802_v43 = vor.u32 %v930_v39, %v801_v38  ;;  %v931_v45 = vld [vmem:[%s1149_s10 + $0x34] sm:$0xf] }
  0x19   : > { %546 = vmatpush.bf16.msra.mxu0 %v941_v9  ;;  %987 = vmatpush.bf16.msra.mxu3 %v941_v9  ;;  %v806_v44 = vor.u32 %v932_v41, %v805_v40  ;;  %v807_v46 = vld [vmem:[%s1149_s10 + $0x3c] sm:$0xf0]  ;;  %v813_v47 = vld [vmem:[%s1149_s10 + $0x38] sm:$0xf]  ;;  %v933_v48 = vld [vmem:[%s1149_s10 + $0x40] sm:$0xf0] }
  0x1a   : > { %575 = vmatpush.bf16.msra.mxu1 %v949_v10  ;;  %v817_v49 = vld [vmem:[%s1149_s10 + $0x48] sm:$0xf]  ;;  %v935_v50 = vld [vmem:[%s1149_s10 + $0x50] sm:$0xf0]  ;;  %v810_v51 = vor.u32 %v931_v45, %v807_v46  ;;  %v814_v52 = vor.u32 %v933_v48, %v813_v47  ;;  %v934_v54 = vld [vmem:[%s1149_s10 + $0x4c] sm:$0xf] }
  0x1b   : > { %604 = vmatpush.bf16.msra.mxu2 %v957_v11  ;;  %v818_v53 = vor.u32 %v935_v50, %v817_v49  ;;  %v819_v55 = vld [vmem:[%s1149_s10 + $0x54] sm:$0xf0]  ;;  %v825_v56 = vld [vmem:[%s1149_s10 + $0x50] sm:$0xf]  ;;  %v936_v57 = vld [vmem:[%s1149_s10 + $0x58] sm:$0xf0] }
  0x1c   : > { %v822_v58 = vor.u32 %v934_v54, %v819_v55  ;;  %v826_v59 = vor.u32 %v936_v57, %v825_v56  ;;  %v1017_v62 = vld [vmem:[%s1211_s2] ss:$0 sm:$0xff] }
  0x1d   : > { %547 = vmatpush.bf16.msra.mxu0 %v940_v12  ;;  %988 = vmatpush.bf16.msra.mxu3 %v940_v12 }
  0x1e   : > { %576 = vmatpush.bf16.msra.mxu1 %v948_v13 }
  0x1f   : > { %605 = vmatpush.bf16.msra.mxu2 %v956_v14 }
  0x21   : > { %548 = vmatpush.bf16.msra.mxu0 %v939_v15  ;;  %989 = vmatpush.bf16.msra.mxu3 %v939_v15 }
  0x22   : > { %577 = vmatpush.bf16.msra.mxu1 %v947_v16 }
  0x23   : > { %606 = vmatpush.bf16.msra.mxu2 %v955_v17 }
  0x25   : > { %549 = vmatpush.bf16.msra.mxu0 %v938_v18  ;;  %990 = vmatpush.bf16.msra.mxu3 %v938_v18 }
  0x26   : > { %578 = vmatpush.bf16.msra.mxu1 %v946_v19 }
  0x27   : > { %607 = vmatpush.bf16.msra.mxu2 %v954_v20 }
  0x29   : > { %550 = vmatpush.bf16.msra.mxu0 %v937_v21  ;;  %991 = vmatpush.bf16.msra.mxu3 %v937_v21 }
  0x2a   : > { %579 = vmatpush.bf16.msra.mxu1 %v945_v22 }
  0x2b   : > { %608 = vmatpush.bf16.msra.mxu2 %v953_v23 }
  0x2c   : > { %551 = vmatmul.bf16.vlgmr.msra.gmra.mxu0 %v782_v32  ;;  %556 = vmatmul.bf16.vlgmr.msra.gmra.mxu3 %v794_v35 }
  0x2d   : > { %580 = vmatmul.bf16.vlgmr.msra.gmra.mxu1 %v786_v33 }
  0x2e   : > { %609 = vmatmul.bf16.vlgmr.msra.gmra.mxu2 %v790_v34 }
  0x3c   : > { %561 = vmatmul.bf16.gmra.mxu3 %v806_v44 }
  0x3d   : > { %585 = vmatmul.bf16.gmra.mxu1 %v798_v42 }
  0x3e   : > { %614 = vmatmul.bf16.gmra.mxu2 %v802_v43 }
  0x4c   : > { %566 = vmatmul.bf16.gmra.mxu3 %v818_v53 }
  0x4d   : > { %590 = vmatmul.bf16.gmra.mxu1 %v810_v51 }
  0x4e   : > { %619 = vmatmul.bf16.gmra.mxu2 %v814_v52 }
  0x5d   : > { %595 = vmatmul.bf16.gmra.mxu1 %v822_v58 }
  0x5e   : > { %624 = vmatmul.bf16.gmra.mxu2 %v826_v59 }
  0xa9   : > { %v552_v60 = vpop.f32.mrf.mxu0 }
  0xaa   : > { %v581_v61 = vpop.f32.mrf.mxu1  ;;  %v553_v63 = vadd.f32 %v1017_v62, %v552_v60 }
  0xac   : > { %v582_v4 = vadd.f32 %v581_v61, %v553_v63 }
  0xaf   : > { %v557_v1 = vpop.f32.mrf.mxu3 }
  0xb0   : > { %v558_v15 = vadd.f32 %v1017_v62, %v557_v1 }
  0xb1   : > { %v610_v0 = vpop.f32.mrf.mxu2  ;;  %v554_v2 = vpop.f32.mrf.mxu0 }
  0xb2   : > { %v583_v3 = vpop.f32.mrf.mxu1  ;;  %v555_v5 = vadd.f32 %v1017_v62, %v554_v2  ;;  %v611_v6 = vadd.f32 %v610_v0, %v582_v4 }
  0xb4   : > { %v584_v7 = vadd.f32 %v583_v3, %v555_v5  ;;  %v630_v12 = vmax.f32 %v611_v6, 0.0 }
  0xb7   : > { %v559_v11 = vpop.f32.mrf.mxu3 }
  0xb8   : > { %v560_v20 = vadd.f32 %v1017_v62, %v559_v11 }
  0xb9   : > { %v612_v8 = vpop.f32.mrf.mxu2 }
  0xba   : > { %v613_v9 = vadd.f32 %v612_v8, %v584_v7  ;;  %v586_v10 = vpop.f32.mrf.mxu1 }
  0xbb   : > { %v587_v18 = vadd.f32 %v586_v10, %v558_v15 }
  0xbc   : > { %v631_v13 = vmax.f32 %v613_v9, 0.0 }
  0xbe   : > { %v964_v14 = vpack.c.bf16 %v631_v13, %v630_v12 }
  0xbf   : > { %v562_v19 = vpop.f32.mrf.mxu3 }
  0xc0   : > { %965 = vst [vmem:[%s1194_s27] sm:$0xff] %v964_v14   ;;  %v563_v30 = vadd.f32 %v1017_v62, %v562_v19 }
  0xc1   : > { %v615_v16 = vpop.f32.mrf.mxu2 }
  0xc2   : > { %v588_v17 = vpop.f32.mrf.mxu1  ;;  %v616_v21 = vadd.f32 %v615_v16, %v587_v18 }
  0xc3   : > { %v589_v22 = vadd.f32 %v588_v17, %v560_v20 }
  0xc4   : > { %v632_v26 = vmax.f32 %v616_v21, 0.0 }
  0xc7   : > { %v564_v29 = vpop.f32.mrf.mxu3 }
  0xc8   : > { %v565_v34 = vadd.f32 %v1017_v62, %v564_v29 }
  0xc9   : > { %v617_v23 = vpop.f32.mrf.mxu2 }
  0xca   : > { %v618_v24 = vadd.f32 %v617_v23, %v589_v22  ;;  %v591_v25 = vpop.f32.mrf.mxu1 }
  0xcb   : > { %v592_v33 = vadd.f32 %v591_v25, %v563_v30 }
  0xcc   : > { %v633_v27 = vmax.f32 %v618_v24, 0.0 }
  0xce   : > { %v969_v28 = vpack.c.bf16 %v633_v27, %v632_v26 }
  0xcf   : > { %v567_v37 = vpop.f32.mrf.mxu3 }
  0xd0   : > { %981 = vst [vmem:[%s1194_s27 + $0x8] sm:$0xff] %v969_v28   ;;  %v568_v44 = vadd.f32 %v1017_v62, %v567_v37 }
  0xd1   : > { %v620_v31 = vpop.f32.mrf.mxu2 }
  0xd2   : > { %v593_v32 = vpop.f32.mrf.mxu1  ;;  %v621_v35 = vadd.f32 %v620_v31, %v592_v33 }
  0xd3   : > { %v594_v36 = vadd.f32 %v593_v32, %v565_v34 }
  0xd4   : > { %v634_v41 = vmax.f32 %v621_v35, 0.0 }
  0xd7   : > { %v569_v46 = vpop.f32.mrf.mxu3 }
  0xd8   : > { %v570_v49 = vadd.f32 %v1017_v62, %v569_v46 }
  0xd9   : > { %v622_v38 = vpop.f32.mrf.mxu2 }
  0xda   : > { %v623_v39 = vadd.f32 %v622_v38, %v594_v36  ;;  %v596_v40 = vpop.f32.mrf.mxu1 }
  0xdb   : > { %v597_v47 = vadd.f32 %v596_v40, %v568_v44 }
  0xdc   : > { %v635_v42 = vmax.f32 %v623_v39, 0.0 }
  0xde   : > { %v974_v43 = vpack.c.bf16 %v635_v42, %v634_v41 }
  0xe0   : > { %982 = vst [vmem:[%s1194_s27 + $0x10] sm:$0xff] %v974_v43  }
  0xe1   : > { %v625_v45 = vpop.f32.mrf.mxu2 }
  0xe2   : > { %v598_v48 = vpop.f32.mrf.mxu1  ;;  %v626_v50 = vadd.f32 %v625_v45, %v597_v47 }
  0xe3   : > { %v599_v51 = vadd.f32 %v598_v48, %v570_v49 }
  0xe4   : > { %v636_v54 = vmax.f32 %v626_v50, 0.0 }
  0xe9   : > { %v627_v52 = vpop.f32.mrf.mxu2 }
  0xea   : > { %v628_v53 = vadd.f32 %v627_v52, %v599_v51 }
  0xec   : > { %v637_v55 = vmax.f32 %v628_v53, 0.0 }
  0xee   : > { %v979_v56 = vpack.c.bf16 %v637_v55, %v636_v54 }
  0xf0   : > { %983 = vst [vmem:[%s1194_s27 + $0x18] sm:$0xff] %v979_v56  }
  0xf1 PF: > { %s13_s14 = sadd.s32 1, %s1040_s14   ;;  %s1213_s12 = smov %s1036_s13 }
  0xf2   : > { %p10_p5 = scmp.ge.s32.totalorder %s13_s14, 4   ;;  %s1214_s13 = smov %s1216_s15 }
  0xf4   :  { %12 = sbr.rel (!%p10_p5) target bundleno = 2 (0x2), region = 68 }

// kernel: basic_block_forward.5
= control target key start
LH: loop header
LB: loop body
LE: loop exit
PB: predicated region body
PF: predicated region fallthrough
CT: control target
= control target key end

     0   :  { %9 = vsyncpa [#allocation3], 0  ;;  %s1906_s0 = inlined_call_operand.vmem [shape: bf16[128,640], index: 0, kind: input, shape index: {}]   ;;  %s1907_s1 = inlined_call_operand.vmem [shape: bf16[640,128], index: 1, kind: input, shape index: {}]   ;;  %s1908_s2 = inlined_call_operand.vmem [shape: f32[1,128], index: 2, kind: input, shape index: {}]   ;;  %s1909_s3 = inlined_call_operand.vmem [shape: f32[128,128], index: 3, kind: input, shape index: {}]   ;;  %s1910_s4 = inlined_call_operand.hbm [shape: f32[128,128], index: 4, kind: output, shape index: {}]  }
   0x1   :  { %11 = vsyncpa [#allocation3 + $0x1], 0  ;;  %s1591_s15 = smov 0   ;;  %s1593_s16 = smov 0  }
   0x2   :  { %s1595_s17 = smov 0   ;;  %s1597_s18 = smov 0  }
   0x3   :  { %s1599_s19 = smov 0   ;;  %s1601_s20 = smov 0  }
   0x4 LB: > { %s1091_s21 = sadd.s32 4294967295, %s1562_s20   ;;  %s1092_s22 = sadd.s32 4294967294, %s1562_s20   ;;  %s1562_s20 = sphi %s1601_s20, %s17_s20   ;;  %s1558_s19 = sphi %s1599_s19, %s1917_s19   ;;  %s1554_s18 = sphi %s1597_s18, %s1916_s18   ;;  %s1550_s17 = sphi %s1595_s17, %s1915_s17   ;;  %s1546_s16 = sphi %s1593_s16, %s1914_s16   ;;  %s1542_s15 = sphi %s1591_s15, %s1913_s15  }
   0x5   : > { %s36_s23 = sadd.s32 1, %s1558_s19  ;;  %s155_s24 = sadd.s32 1, %s1550_s17 }
   0x6   : > { %p38_p0 = scmp.ge.s32.totalorder %s36_s23, 2  ;;  %p165_p1 = scmp.ne.s32.totalorder %s1550_s17, %s1546_s16 }
   0x7   : > { %p166_p2 = scmp.eq.s32.totalorder %s1091_s21, 1  ;;  %p171_p3 = scmp.ne.s32.totalorder %s1546_s16, %s1542_s15 }
   0x8   : > { %s1919_s23 = smov (%p38_p0, %s36_s23), 0  ;;  %p172_p5 = scmp.eq.s32.totalorder %s1092_s22, 1 }
   0x9   : > { %p1631_p4 = por %p166_p2, %p165_p1  ;;  %s150_s26 = ssub.s32 %s1558_s19, %s1919_s23 }
   0xa   : > { %p1097_p6 = scmp.ge.s32.totalorder %s1562_s20, 1  ;;  %p153_p7 = scmp.eq.s32.totalorder %s150_s26, 0 }
   0xb   : > { %p1638_p8 = por %p172_p5, %p171_p3  ;;  %p235_p9 = scmp.lt.s32.totalorder %s1562_s20, 3 }
   0xc   : > { %s1644_s28 = scalar_select %p153_p7, %s1550_s17, %s155_s24  }
   0xd   : > { %p236_p10 = pnand %p1097_p6, %p235_p9 }
   0xe   : > { %s1099_s29 = sshll.u32 (!%p236_p10), %s1554_s18, 3  ;;  %s282_s6 = sand.u32 (!%p236_p10), 1, %s1546_s16  }
   0xf   : > { %239 = sbr.rel (%p236_p10) target bundleno = 282 (0x11a), region = 36  ;;  %p287_p11 = scmp.lt.s32.totalorder (!%p236_p10), %s1099_s29, 15 }
  0x10   : > { %s1408_s7 = sshll.u32 (!%p236_p10), %s1554_s18, 6  ;;  %s949_s18 = scalar_lea.sflag (!%p236_p10), [#allocation3], %s282_s6 }
  0x11   : > { %s961_s10 = scalar_lea.hbm (!%p236_p10), %s1910_s4, %s1408_s7  ;;  %s1504_s24 = scalar_lea.hbm (!%p236_p10), %s1910_s4, 128 }
  0x12   : > { %s964_s12 = sshll.u32 (!%p236_p10), %s961_s10, 4  ;;  %s965_s12 = int_to_ptr.hbm [resolvable:$true] %s964_s12 }
  0x13   : > { %s1498_s13 = sshra.s32 (!%p236_p10), %s965_s12, 4  ;;  %s1499_s13 = int_to_ptr.hbm [resolvable:$true] %s1498_s13 }
  0x14   : > { %v1375_v0 = vld [vmem:[%s1907_s1 + $0x38] sm:$0xff]  ;;  %v1374_v2 = vld [vmem:[%s1907_s1 + $0x30] sm:$0xff]  ;;  %v1373_v6 = vld [vmem:[%s1907_s1 + $0x28] sm:$0xff]  ;;  %s1921_s29 = smov (!%p287_p11, %s1099_s29), 15  ;;  %p1505_p1 = scmp.lt.s32.totalorder %s1499_s13, %s1910_s4 }
  0x15   : > { %v1391_v1 = vld [vmem:[%s1907_s1 + $0xb8] sm:$0xff]  ;;  %1409 = vmatpush.bf16.msra.mxu1 %v1375_v0  ;;  %771 = vmatpush.bf16.msra.mxu0 %v1375_v0  ;;  %v1390_v3 = vld [vmem:[%s1907_s1 + $0xb0] sm:$0xff]  ;;  %v1389_v7 = vld [vmem:[%s1907_s1 + $0xa8] sm:$0xff]  ;;  %s1425_s5 = smul.u32 20, %s1921_s29  ;;  %s1102_s22 = sshll.u32 %s1921_s29, 3 }
  0x16   : > { %829 = vmatpush.bf16.msra.mxu2 %v1391_v1  ;;  %v1399_v4 = vld [vmem:[%s1907_s1 + $0xf8] sm:$0xff]  ;;  %v1398_v5 = vld [vmem:[%s1907_s1 + $0xf0] sm:$0xff]  ;;  %v1397_v8 = vld [vmem:[%s1907_s1 + $0xe8] sm:$0xff]  ;;  %s1833_s30 = scalar_lea.vmem %s1909_s3, %s1102_s22 }
  0x17   : > { %858 = vmatpush.bf16.msra.mxu3 %v1399_v4  ;;  %v1372_v9 = vld [vmem:[%s1907_s1 + $0x20] sm:$0xff]  ;;  %v1371_v12 = vld [vmem:[%s1907_s1 + $0x18] sm:$0xff]  ;;  %v1370_v15 = vld [vmem:[%s1907_s1 + $0x10] sm:$0xff]  ;;  %s1710_s14 = scalar_lea.vmem %s1906_s0, %s1425_s5  ;;  %s1098_s5 = sshll.u32 %s282_s6, 6 }
  0x18   : > { %v1388_v10 = vld [vmem:[%s1907_s1 + $0xa0] sm:$0xff]  ;;  %v1387_v13 = vld [vmem:[%s1907_s1 + $0x98] sm:$0xff]  ;;  %v1386_v16 = vld [vmem:[%s1907_s1 + $0x90] sm:$0xff]  ;;  %s1840_s29 = scalar_lea.vmem [#allocation2], %s1098_s5 }
  0x19   : > { %1410 = vmatpush.bf16.msra.mxu1 %v1374_v2  ;;  %772 = vmatpush.bf16.msra.mxu0 %v1374_v2  ;;  %v1396_v11 = vld [vmem:[%s1907_s1 + $0xe0] sm:$0xff]  ;;  %v1395_v14 = vld [vmem:[%s1907_s1 + $0xd8] sm:$0xff]  ;;  %v1394_v17 = vld [vmem:[%s1907_s1 + $0xd0] sm:$0xff]  ;;  %s962_s11 = sshll.u32 %s1840_s29, 4  ;;  %s963_s11 = int_to_ptr.vmem [resolvable:$true] %s962_s11 }
  0x1a   : > { %830 = vmatpush.bf16.msra.mxu2 %v1390_v3  ;;  %v1369_v18 = vld [vmem:[%s1907_s1 + $0x8] sm:$0xff]  ;;  %v1368_v20 = vld [vmem:[%s1907_s1] sm:$0xff]  ;;  %v1145_v21 = vld [vmem:[%s1710_s14 + $0x50] sm:$0xf] }
  0x1b   : > { %859 = vmatpush.bf16.msra.mxu3 %v1398_v5  ;;  %v1385_v19 = vld [vmem:[%s1907_s1 + $0x88] sm:$0xff]  ;;  %v1383_v22 = vld [vmem:[%s1907_s1 + $0x78] sm:$0xff]  ;;  %v1360_v24 = vld [vmem:[%s1710_s14 + $0x60] sm:$0xf0] }
  0x1c   : > { %v1393_v23 = vld [vmem:[%s1907_s1 + $0xc8] sm:$0xff]  ;;  %v1105_v25 = vld [vmem:[%s1710_s14] sm:$0xf]  ;;  %v1350_v26 = vld [vmem:[%s1710_s14 + $0x10] sm:$0xf0]  ;;  %v1146_v31 = vor.u32 %v1360_v24, %v1145_v21 }
  0x1d   : > { %1411 = vmatpush.bf16.msra.mxu1 %v1373_v6  ;;  %773 = vmatpush.bf16.msra.mxu0 %v1373_v6  ;;  %v1384_v27 = vld [vmem:[%s1907_s1 + $0x80] sm:$0xff]  ;;  %v1113_v28 = vld [vmem:[%s1710_s14 + $0x8] sm:$0xf]  ;;  %v1351_v29 = vld [vmem:[%s1710_s14 + $0x18] sm:$0xf0]  ;;  %v1106_v32 = vor.u32 %v1350_v26, %v1105_v25 }
  0x1e   : > { %831 = vmatpush.bf16.msra.mxu2 %v1389_v7  ;;  %v1407_v30 = vld [vmem:[%s1907_s1 + $0x138] sm:$0xff]  ;;  %v1114_v33 = vor.u32 %v1351_v29, %v1113_v28  ;;  %v1392_v34 = vld [vmem:[%s1907_s1 + $0xc0] sm:$0xff]  ;;  %v1349_v35 = vld [vmem:[%s1710_s14 + $0xc] sm:$0xf] }
  0x1f   : > { %860 = vmatpush.bf16.msra.mxu3 %v1397_v8  ;;  %v1115_v36 = vld [vmem:[%s1710_s14 + $0x1c] sm:$0xf0]  ;;  %v1382_v37 = vld [vmem:[%s1907_s1 + $0x70] sm:$0xff]  ;;  %v1381_v40 = vld [vmem:[%s1907_s1 + $0x68] sm:$0xff] }
  0x20   : > { %v1406_v38 = vld [vmem:[%s1907_s1 + $0x130] sm:$0xff]  ;;  %v1118_v39 = vor.u32 %v1349_v35, %v1115_v36  ;;  %v1405_v41 = vld [vmem:[%s1907_s1 + $0x128] sm:$0xff]  ;;  %v1380_v42 = vld [vmem:[%s1907_s1 + $0x60] sm:$0xff] }
  0x21   : > { %1412 = vmatpush.bf16.msra.mxu1 %v1372_v9  ;;  %774 = vmatpush.bf16.msra.mxu0 %v1372_v9  ;;  %v1404_v43 = vld [vmem:[%s1907_s1 + $0x120] sm:$0xff]  ;;  %v1165_v44 = vld [vmem:[%s1710_s14 + $0x78] sm:$0xf]  ;;  %v1365_v45 = vld [vmem:[%s1710_s14 + $0x88] sm:$0xf0] }
  0x22   : > { %832 = vmatpush.bf16.msra.mxu2 %v1388_v10  ;;  %v1125_v46 = vld [vmem:[%s1710_s14 + $0x28] sm:$0xf]  ;;  %v1355_v47 = vld [vmem:[%s1710_s14 + $0x38] sm:$0xf0]  ;;  %v1133_v49 = vld [vmem:[%s1710_s14 + $0x30] sm:$0xf]  ;;  %v1166_v52 = vor.u32 %v1365_v45, %v1165_v44 }
  0x23   : > { %861 = vmatpush.bf16.msra.mxu3 %v1396_v11  ;;  %v1379_v48 = vld [vmem:[%s1907_s1 + $0x58] sm:$0xff]  ;;  %v1356_v50 = vld [vmem:[%s1710_s14 + $0x40] sm:$0xf0]  ;;  %v1126_v53 = vor.u32 %v1355_v47, %v1125_v46  ;;  %v1354_v55 = vld [vmem:[%s1710_s14 + $0x34] sm:$0xf] }
  0x24   : > { %v1403_v51 = vld [vmem:[%s1907_s1 + $0x118] sm:$0xff]  ;;  %v1134_v54 = vor.u32 %v1356_v50, %v1133_v49  ;;  %v1135_v56 = vld [vmem:[%s1710_s14 + $0x44] sm:$0xf0]  ;;  %v1378_v57 = vld [vmem:[%s1907_s1 + $0x50] sm:$0xff] }
  0x25   : > { %1413 = vmatpush.bf16.msra.mxu1 %v1371_v12  ;;  %775 = vmatpush.bf16.msra.mxu0 %v1371_v12  ;;  %v1402_v58 = vld [vmem:[%s1907_s1 + $0x110] sm:$0xff]  ;;  %v1138_v59 = vor.u32 %v1354_v55, %v1135_v56  ;;  %v1377_v60 = vld [vmem:[%s1907_s1 + $0x48] sm:$0xff]  ;;  %v1376_v62 = vld [vmem:[%s1907_s1 + $0x40] sm:$0xff] }
  0x26   : > { %833 = vmatpush.bf16.msra.mxu2 %v1387_v13  ;;  %v1401_v61 = vld [vmem:[%s1907_s1 + $0x108] sm:$0xff]  ;;  %v1400_v63 = vld [vmem:[%s1907_s1 + $0x100] sm:$0xff]  ;;  %v1107_v1 = vld [vmem:[%s1710_s14 + $0x14] sm:$0xf0] }
  0x27   : > { %862 = vmatpush.bf16.msra.mxu3 %v1395_v14  ;;  %v1348_v0 = vld [vmem:[%s1710_s14 + $0x4] sm:$0xf]  ;;  %v1121_v2 = vld [vmem:[%s1710_s14 + $0x10] sm:$0xf]  ;;  %v1153_v4 = vld [vmem:[%s1710_s14 + $0x58] sm:$0xf] }
  0x28   : > { %v1352_v3 = vld [vmem:[%s1710_s14 + $0x20] sm:$0xf0]  ;;  %v1361_v5 = vld [vmem:[%s1710_s14 + $0x68] sm:$0xf0]  ;;  %v1110_v6 = vor.u32 %v1348_v0, %v1107_v1  ;;  %v1359_v9 = vld [vmem:[%s1710_s14 + $0x5c] sm:$0xf] }
  0x29   : > { %1414 = vmatpush.bf16.msra.mxu1 %v1370_v15  ;;  %776 = vmatpush.bf16.msra.mxu0 %v1370_v15  ;;  %v1122_v7 = vor.u32 %v1352_v3, %v1121_v2  ;;  %v1154_v8 = vor.u32 %v1361_v5, %v1153_v4  ;;  %v1155_v10 = vld [vmem:[%s1710_s14 + $0x6c] sm:$0xf0]  ;;  %v1353_v12 = vld [vmem:[%s1710_s14 + $0x2c] sm:$0xf]  ;;  %v1127_v13 = vld [vmem:[%s1710_s14 + $0x3c] sm:$0xf0] }
  0x2a   : > { %834 = vmatpush.bf16.msra.mxu2 %v1386_v16  ;;  %v1158_v11 = vor.u32 %v1359_v9, %v1155_v10  ;;  %v1141_v14 = vld [vmem:[%s1710_s14 + $0x38] sm:$0xf]  ;;  %v1357_v15 = vld [vmem:[%s1710_s14 + $0x48] sm:$0xf0]  ;;  %v1173_v16 = vld [vmem:[%s1710_s14 + $0x80] sm:$0xf] }
  0x2b   : > { %863 = vmatpush.bf16.msra.mxu3 %v1394_v17  ;;  %v1366_v17 = vld [vmem:[%s1710_s14 + $0x90] sm:$0xf0]  ;;  %v1364_v21 = vld [vmem:[%s1710_s14 + $0x84] sm:$0xf]  ;;  %v1147_v25 = vld [vmem:[%s1710_s14 + $0x64] sm:$0xf0] }
  0x2c   : > { %v1358_v24 = vld [vmem:[%s1710_s14 + $0x54] sm:$0xf]  ;;  %v1161_v26 = vld [vmem:[%s1710_s14 + $0x60] sm:$0xf]  ;;  %v1181_v28 = vld [vmem:[%s1710_s14 + $0x88] sm:$0xf] }
  0x2d   : > { %1415 = vmatpush.bf16.msra.mxu1 %v1369_v18  ;;  %777 = vmatpush.bf16.msra.mxu0 %v1369_v18  ;;  %v1130_v18 = vor.u32 %v1353_v12, %v1127_v13  ;;  %v1367_v29 = vld [vmem:[%s1710_s14 + $0x98] sm:$0xf0]  ;;  %v917_v5 = vld [vmem:[%s1833_s30 + $0x8] sm:$0xff] }
  0x2e   : > { %835 = vmatpush.bf16.msra.mxu2 %v1385_v19  ;;  %v1142_v19 = vor.u32 %v1357_v15, %v1141_v14 }
  0x2f   : > { %864 = vmatpush.bf16.msra.mxu3 %v1393_v23 }
  0x31   : > { %1416 = vmatpush.bf16.msra.mxu1 %v1368_v20  ;;  %778 = vmatpush.bf16.msra.mxu0 %v1368_v20  ;;  %v1174_v20 = vor.u32 %v1366_v17, %v1173_v16  ;;  %v918_v17 = vld [vmem:[%s1833_s30 + $0x10] sm:$0xff] }
  0x32   : > { %836 = vmatpush.bf16.msra.mxu2 %v1384_v27  ;;  %v1362_v27 = vld [vmem:[%s1710_s14 + $0x70] sm:$0xf0] }
  0x33   : > { %865 = vmatpush.bf16.msra.mxu3 %v1392_v34  ;;  %v1167_v34 = vld [vmem:[%s1710_s14 + $0x8c] sm:$0xf0] }
  0x34   : > { %789 = vmatmul.bf16.vlgmr.msra.gmra.mxu1 %v1146_v31  ;;  %779 = vmatmul.bf16.vlgmr.msra.gmra.mxu0 %v1106_v32  ;;  %v1162_v31 = vor.u32 %v1362_v27, %v1161_v26  ;;  %v1182_v32 = vor.u32 %v1367_v29, %v1181_v28  ;;  %v919_v28 = vld [vmem:[%s1833_s30 + $0x18] sm:$0xff] }
  0x35   : > { %800 = vmatpush.bf16.msrb.mxu1 %v1383_v22  ;;  %887 = vmatpush.bf16.msrb.mxu0 %v1407_v30  ;;  %v1175_v22 = vld [vmem:[%s1710_s14 + $0x94] sm:$0xf0] }
  0x36   : > { %1417 = vmatpush.bf16.msrb.mxu2 %v1407_v30  ;;  %866 = vmatmul.bf16.vlgmr.msra.gmra.mxu3 %v1118_v39  ;;  %v1178_v23 = vor.u32 %v1364_v21, %v1175_v22  ;;  %v1150_v30 = vor.u32 %v1358_v24, %v1147_v25 }
  0x37   : > { %837 = vmatmul.bf16.vlgmr.msra.gmra.mxu2 %v1114_v33  ;;  %v1363_v33 = vld [vmem:[%s1710_s14 + $0x7c] sm:$0xf]  ;;  %s1500_s14 = scalar_lea.hbm %s1499_s13, 64 }
  0x38   : > { %v1170_v35 = vor.u32 %v1363_v33, %v1167_v34  ;;  %p1501_p12 = scmp.ne.s32.totalorder %s1499_s13, %s1500_s14  ;;  %p1506_p2 = scmp.lt.s32.totalorder %s1504_s24, %s1500_s14 }
  0x39   : > { %801 = vmatpush.bf16.msrb.mxu1 %v1382_v37  ;;  %888 = vmatpush.bf16.msrb.mxu0 %v1406_v38 }
  0x3a   : > { %1418 = vmatpush.bf16.msrb.mxu2 %v1406_v38  ;;  %p1502_p13 = pnand %p1501_p12, %p1631_p4  ;;  %p1507_p3 = por %p1506_p2, %p1505_p1 }
  0x3c   : > { %p1503_p0 = pneg %p1502_p13 }
  0x3d   : > { %802 = vmatpush.bf16.msrb.mxu1 %v1381_v40  ;;  %889 = vmatpush.bf16.msrb.mxu0 %v1405_v41 }
  0x3e   : > { %1419 = vmatpush.bf16.msrb.mxu2 %v1405_v41  ;;  %p1508_p5 = pnand %p1507_p3, %p1503_p0 }
  0x41   : > { %803 = vmatpush.bf16.msrb.mxu1 %v1380_v42  ;;  %890 = vmatpush.bf16.msrb.mxu0 %v1404_v43 }
  0x42   : > { %1420 = vmatpush.bf16.msrb.mxu2 %v1404_v43 }
  0x44   : > { %794 = vmatmul.bf16.gmra.mxu1 %v1166_v52  ;;  %784 = vmatmul.bf16.gmra.mxu0 %v1126_v53 }
  0x45   : > { %804 = vmatpush.bf16.msrb.mxu1 %v1379_v48  ;;  %891 = vmatpush.bf16.msrb.mxu0 %v1403_v51  ;;  %v1826_v48 = vld [vmem:[%s1908_s2] ss:$0 sm:$0xff] }
  0x46   : > { %1421 = vmatpush.bf16.msrb.mxu2 %v1403_v51  ;;  %871 = vmatmul.bf16.gmra.mxu3 %v1138_v59 }
  0x47   : > { %842 = vmatmul.bf16.gmra.mxu2 %v1134_v54 }
  0x49   : > { %805 = vmatpush.bf16.msrb.mxu1 %v1378_v57  ;;  %892 = vmatpush.bf16.msrb.mxu0 %v1402_v58  ;;  %v916_v57 = vld [vmem:[%s1833_s30] sm:$0xff] }
  0x4a   : > { %1422 = vmatpush.bf16.msrb.mxu2 %v1402_v58 }
  0x4d   : > { %806 = vmatpush.bf16.msrb.mxu1 %v1377_v60  ;;  %893 = vmatpush.bf16.msrb.mxu0 %v1401_v61 }
  0x4e   : > { %1423 = vmatpush.bf16.msrb.mxu2 %v1401_v61 }
  0x51   : > { %807 = vmatpush.bf16.msrb.mxu1 %v1376_v62  ;;  %894 = vmatpush.bf16.msrb.mxu0 %v1400_v63 }
  0x52   : > { %1424 = vmatpush.bf16.msrb.mxu2 %v1400_v63 }
  0x54   : > { %808 = vmatmul.bf16.vlgmr.msrb.gmra.mxu1 %v1110_v6  ;;  %895 = vmatmul.bf16.vlgmr.msrb.gmra.mxu0 %v1122_v7 }
  0x56   : > { %876 = vmatmul.bf16.gmra.mxu3 %v1158_v11 }
  0x57   : > { %847 = vmatmul.bf16.gmra.mxu2 %v1154_v8 }
  0x64   : > { %813 = vmatmul.bf16.gmra.mxu1 %v1130_v18  ;;  %900 = vmatmul.bf16.gmra.mxu0 %v1142_v19 }
  0x66   : > { %881 = vmatmul.bf16.gmra.mxu3 %v1178_v23 }
  0x67   : > { %852 = vmatmul.bf16.gmra.mxu2 %v1174_v20 }
  0x74   : > { %818 = vmatmul.bf16.gmra.mxu1 %v1150_v30  ;;  %905 = vmatmul.bf16.gmra.mxu0 %v1162_v31 }
  0x77   : > { %910 = vmatmul.bf16.vlgmr.msrb.gmra.mxu2 %v1182_v32 }
  0x84   : > { %823 = vmatmul.bf16.gmra.mxu1 %v1170_v35 }
  0xb1   : > { %v1815_v36 = vpop.f32.mrf.mxu1  ;;  %v780_v37 = vpop.f32.mrf.mxu0 }
  0xb2   : > { %v781_v49 = vadd.f32 %v1826_v48, %v780_v37  ;;  %v791_v29 = vadd.f32 %v1826_v48, %v1815_v36 }
  0xb9   : > { %v1817_v39 = vpop.f32.mrf.mxu1  ;;  %v782_v40 = vpop.f32.mrf.mxu0 }
  0xba   : > { %v838_v38 = vpop.f32.mrf.mxu2  ;;  %v867_v44 = vpop.f32.mrf.mxu3  ;;  %v783_v58 = vadd.f32 %v1826_v48, %v782_v40 }
  0xc1   : > { %v1819_v42 = vpop.f32.mrf.mxu1  ;;  %v785_v43 = vpop.f32.mrf.mxu0 }
  0xc2   : > { %v840_v41 = vpop.f32.mrf.mxu2  ;;  %v869_v50 = vpop.f32.mrf.mxu3  ;;  %v786_v6 = vadd.f32 %v1826_v48, %v785_v43  ;;  %v793_v43 = vadd.f32 %v1826_v48, %v1817_v39 }
  0xc9   : > { %v1821_v46 = vpop.f32.mrf.mxu1  ;;  %v787_v47 = vpop.f32.mrf.mxu0 }
  0xca   : > { %v843_v45 = vpop.f32.mrf.mxu2  ;;  %v872_v0 = vpop.f32.mrf.mxu3  ;;  %v788_v18 = vadd.f32 %v1826_v48, %v787_v47 }
  0xd1   : > { %v809_v51 = vpop.f32.mrf.mxu1  ;;  %v896_v52 = vpop.f32.mrf.mxu0 }
  0xd2   : > { %v810_v53 = vadd.f32 %v809_v51, %v781_v49  ;;  %v845_v54 = vpop.f32.mrf.mxu2  ;;  %v874_v14 = vpop.f32.mrf.mxu3 }
  0xd4   : > { %v839_v55 = vadd.f32 %v838_v38, %v810_v53 }
  0xd6   : > { %v868_v56 = vadd.f32 %v867_v44, %v839_v55  ;;  %v921_v55 = vld [vmem:[%s1833_s30 + $0x28] sm:$0xff] }
  0xd8   : > { %v897_v59 = vadd.f32 %v896_v52, %v868_v56  ;;  %v796_v56 = vadd.f32 %v1826_v48, %v1819_v42 }
  0xd9   : > { %v811_v60 = vpop.f32.mrf.mxu1  ;;  %v898_v61 = vpop.f32.mrf.mxu0 }
  0xda   : > { %v924_v62 = vadd.f32 %v916_v57, %v897_v59  ;;  %v812_v63 = vadd.f32 %v811_v60, %v783_v58  ;;  %v848_v3 = vpop.f32.mrf.mxu2  ;;  %v877_v27 = vpop.f32.mrf.mxu3 }
  0xdc   : > { %v932_v1 = vmax.f32 %v924_v62, 0.0  ;;  %v841_v2 = vadd.f32 %v840_v41, %v812_v63  ;;  %v920_v41 = vld [vmem:[%s1833_s30 + $0x20] sm:$0xff] }
  0xde   : > { %940 = vst [vmem:[%s1840_s29] sm:$0xff] %v932_v1  ;;  %v870_v4 = vadd.f32 %v869_v50, %v841_v2  ;;  %v922_v1 = vld [vmem:[%s1833_s30 + $0x30] sm:$0xff]  ;;  %v798_v2 = vadd.f32 %v1826_v48, %v1821_v46 }
  0xe0   : > { %v899_v7 = vadd.f32 %v898_v61, %v870_v4 }
  0xe1   : > { %v814_v8 = vpop.f32.mrf.mxu1  ;;  %v901_v9 = vpop.f32.mrf.mxu0 }
  0xe2   : > { %v925_v10 = vadd.f32 %v917_v5, %v899_v7  ;;  %v815_v11 = vadd.f32 %v814_v8, %v786_v6  ;;  %v850_v16 = vpop.f32.mrf.mxu2 }
  0xe4   : > { %v933_v12 = vmax.f32 %v925_v10, 0.0  ;;  %v844_v13 = vadd.f32 %v843_v45, %v815_v11  ;;  %v879_v45 = vpop.f32.mrf.mxu3  ;;  %v923_v11 = vld [vmem:[%s1833_s30 + $0x38] sm:$0xff] }
  0xe6   : > { %941 = vst [vmem:[%s1840_s29 + $0x8] sm:$0xff] %v933_v12  ;;  %v873_v15 = vadd.f32 %v872_v0, %v844_v13 }
  0xe8   : > { %v902_v19 = vadd.f32 %v901_v9, %v873_v15 }
  0xe9   : > { %v816_v20 = vpop.f32.mrf.mxu1  ;;  %v903_v21 = vpop.f32.mrf.mxu0 }
  0xea   : > { %v926_v22 = vadd.f32 %v918_v17, %v902_v19  ;;  %v817_v23 = vadd.f32 %v816_v20, %v788_v18  ;;  %v853_v31 = vpop.f32.mrf.mxu2 }
  0xec   : > { %v934_v24 = vmax.f32 %v926_v22, 0.0  ;;  %v846_v25 = vadd.f32 %v845_v54, %v817_v23  ;;  %v882_v60 = vpop.f32.mrf.mxu3 }
  0xee   : > { %942 = vst [vmem:[%s1840_s29 + $0x10] sm:$0xff] %v934_v24  ;;  %v875_v26 = vadd.f32 %v874_v14, %v846_v25 }
  0xf0   : > { %v904_v30 = vadd.f32 %v903_v21, %v875_v26 }
  0xf1   : > { %v819_v32 = vpop.f32.mrf.mxu1  ;;  %v906_v35 = vpop.f32.mrf.mxu0 }
  0xf2   : > { %v927_v33 = vadd.f32 %v919_v28, %v904_v30  ;;  %v820_v34 = vadd.f32 %v819_v32, %v791_v29  ;;  %v855_v50 = vpop.f32.mrf.mxu2 }
  0xf4   : > { %v935_v37 = vmax.f32 %v927_v33, 0.0  ;;  %v849_v38 = vadd.f32 %v848_v3, %v820_v34  ;;  %v884_v8 = vpop.f32.mrf.mxu3 }
  0xf6   : > { %943 = vst [vmem:[%s1840_s29 + $0x18] sm:$0xff] %v935_v37  ;;  %v878_v40 = vadd.f32 %v877_v27, %v849_v38 }
  0xf8   : > { %v907_v44 = vadd.f32 %v906_v35, %v878_v40 }
  0xf9   : > { %v821_v47 = vpop.f32.mrf.mxu1  ;;  %v908_v53 = vpop.f32.mrf.mxu0 }
  0xfa   : > { %v928_v36 = vadd.f32 %v920_v41, %v907_v44  ;;  %v822_v49 = vadd.f32 %v821_v47, %v793_v43  ;;  %v911_v63 = vpop.f32.mrf.mxu2 }
  0xfc   : > { %v936_v51 = vmax.f32 %v928_v36, 0.0  ;;  %v851_v52 = vadd.f32 %v850_v16, %v822_v49 }
  0xfe   : > { %944 = vst [vmem:[%s1840_s29 + $0x20] sm:$0xff] %v936_v51  ;;  %v880_v54 = vadd.f32 %v879_v45, %v851_v52 }
 0x100   : > { %v909_v57 = vadd.f32 %v908_v53, %v880_v54 }
 0x101   : > { %v824_v39 = vpop.f32.mrf.mxu1 }
 0x102   : > { %v929_v58 = vadd.f32 %v921_v55, %v909_v57  ;;  %v825_v59 = vadd.f32 %v824_v39, %v796_v56  ;;  %v913_v10 = vpop.f32.mrf.mxu2 }
 0x104   : > { %v937_v61 = vmax.f32 %v929_v58, 0.0  ;;  %v854_v62 = vadd.f32 %v853_v31, %v825_v59 }
 0x106   : > { %945 = vst [vmem:[%s1840_s29 + $0x28] sm:$0xff] %v937_v61  ;;  %v883_v0 = vadd.f32 %v882_v60, %v854_v62 }
 0x108   : > { %v912_v3 = vadd.f32 %v911_v63, %v883_v0 }
 0x109   : > { %v826_v42 = vpop.f32.mrf.mxu1 }
 0x10a   : > { %v930_v4 = vadd.f32 %v922_v1, %v912_v3  ;;  %v827_v5 = vadd.f32 %v826_v42, %v798_v2 }
 0x10c   : > { %v938_v6 = vmax.f32 %v930_v4, 0.0  ;;  %v856_v7 = vadd.f32 %v855_v50, %v827_v5 }
 0x10e   : > { %946 = vst [vmem:[%s1840_s29 + $0x30] sm:$0xff] %v938_v6  ;;  %v885_v9 = vadd.f32 %v884_v8, %v856_v7 }
 0x110   : > { %v914_v46 = vadd.f32 %v913_v10, %v885_v9 }
 0x112   : > { %v931_v48 = vadd.f32 %v923_v11, %v914_v46 }
 0x114   : > { %v939_v12 = vmax.f32 %v931_v48, 0.0 }
 0x116   : > { %947 = vst [vmem:[%s1840_s29 + $0x38] sm:$0xff] %v939_v12 }
 0x117   : > { %1511 = shalt.err (!%p1508_p5)
}
 0x118   : > { %s1564_s6 = smov 128   ;;  %s1565_s5 = smov 8  }
 0x119   : > { %1426 = dma.vmem_to_hbm [thread:$0]  (%p1631_p4), %s963_s11, 1024, %s965_s12, %s949_s18, %s1564_s6, %s1564_s6, %s1565_s5  }
 0x11a PF: > { %p1432_p6 = scmp.ge.s32.totalorder %s1562_s20, 2  ;;  %s979_s29 = sand.u32 1, %s1542_s15  }
 0x11b   : > { %s980_s7 = scalar_lea.sflag [#allocation3], %s979_s29 }
 0x11c   : > { %p1429_p7 = pnand %p1432_p6, %p1638_p8 }
 0x11e   : > { %p1430_p9 = pneg %p1429_p7 }
 0x120   : > { %1537 = dma.done.wait (%p1430_p9), %s980_s7, 1024  }
 0x121   : > { %1539 = vsyncadd (%p1430_p9), %s980_s7, 4294966272  ;;  %s17_s20 = sadd.s32 1, %s1562_s20   ;;  %s1913_s15 = smov %s1546_s16 }
 0x122   : > { %p14_p10 = scmp.ge.s32.totalorder %s17_s20, 4   ;;  %s1914_s16 = smov %s1550_s17 }
 0x123   : > { %s1915_s17 = smov %s1644_s28  ;;  %s1916_s18 = smov %s1558_s19 }
 0x124   : > { %s1917_s19 = smov %s1919_s23  ;;  %16 = sbr.rel (!%p14_p10) target bundleno = 4 (0x4), region = 80 }
 0x129   :  { %986 = vsyncpa [#allocation3], 1 }
 0x12a   :  { %988 = vsyncpa [#allocation3 + $0x1], 1 }

</bundles_post_ra>
